<compile_context>
chip_gen: v5e
topology: v5e:2x2
jax: 0.10.0
libtpu: 0.0.40
codegen_flags: <defaults>
</compile_context>

<pallas_src>
from functools import lru_cache

import numpy as np
import jax
import jax.numpy as jnp
from jax.experimental import pallas as pl
from jax.experimental.pallas import tpu as pltpu

GRID_H = 36
GRID_W = 64
THRESHOLD = 0.2  # fraction of grid pixels

INTRINSIC = np.array([[492.23822021, 0.0, 320.57855225],
                      [0.0, 492.23822021, 181.67709351],
                      [0.0, 0.0, 1.0]])


def z2xy_coefficient(grid_height, grid_width, grid_num_h, grid_num_w,
                     intrinsic_matrix=INTRINSIC):
    grid_cx = np.linspace((grid_width - 1) / 2,
                          grid_width * grid_num_w - 1 - (grid_width - 1) / 2,
                          grid_num_w)
    grid_cy = np.linspace((grid_height - 1) / 2,
                          grid_height * grid_num_h - 1 - (grid_height - 1) / 2,
                          grid_num_h)
    grid_cx, grid_cy = np.meshgrid(grid_cx, grid_cy)
    fx = intrinsic_matrix[0, 0]
    fy = intrinsic_matrix[1, 1]
    cx = intrinsic_matrix[0, 2]
    cy = intrinsic_matrix[1, 2]
    x_coefficient = ((grid_cx - cx) / fx).flatten()
    y_coefficient = ((cy - grid_cy) / fy).flatten()
    return x_coefficient, y_coefficient


@lru_cache(maxsize=None)
def _grid_constants(gnh, gnw):
    """Shape-dependent device constants, computed once per (gnh, gnw)."""
    W = gnw * GRID_W
    z2x, z2y = z2xy_coefficient(GRID_H, GRID_W, gnh, gnw)
    coef = np.stack([z2x.reshape(gnh, gnw), z2y.reshape(gnh, gnw)], axis=1)  # (gnh,2,gnw)
    col = np.arange(W) // GRID_W
    sel = (col[:, None] == np.arange(gnw)[None, :]).astype(np.float32)       # (W, gnw)
    return (jnp.asarray(coef, dtype=jnp.float32),
            jnp.asarray(sel, dtype=jnp.float32))


def _pick_tgh(gnh, W):
    """Grid-rows per block: divisor of gnh, <= ~2 MiB per input block, and
    leaving >= 2 grid steps when possible so the pipeline can double-buffer."""
    budget = max(1, (2 * 1024 * 1024) // (GRID_H * W * 4))
    cap = max(1, min(budget, gnh // 2 if gnh >= 2 else 1))
    best = 1
    for t in range(1, cap + 1):
        if gnh % t == 0:
            best = t
    return best


def _post_kernel(mask_ref, depth_ref, sel_ref, coef_ref, out_ref):
    m = mask_ref[...]            # (TGH, 36, W) raw logits
    d = depth_ref[...]           # (TGH, 36, W) depth in mm

    keep = m > 0.0                                   # == sigmoid(m) > 0.5
    filtered = jnp.where(keep, d, jnp.zeros_like(d))  # masked raw depth (mm)
    pos = (filtered > 0.0).astype(jnp.float32)

    # Reduce the 36 rows of each grid cell (sublane axis), then the 64-wide
    # column segments via the MXU with a 0/1 selection matrix.
    col_sum = jnp.sum(filtered, axis=1)              # (TGH, W)
    col_cnt = jnp.sum(pos, axis=1)                   # (TGH, W)

    sel = sel_ref[...]                               # (W, gnw)
    total = jnp.dot(col_sum, sel, preferred_element_type=jnp.float32)  # (TGH, gnw)
    count = jnp.dot(col_cnt, sel, preferred_element_type=jnp.float32)  # (TGH, gnw)

    nz = jnp.where(count == 0.0, -jnp.ones_like(count), count)
    z = (total * jnp.float32(1e-3)) / nz             # /1000 folded into epilogue
    thr = jnp.float32(THRESHOLD * GRID_H * GRID_W)
    label = jnp.where(nz > thr, jnp.ones_like(nz), jnp.zeros_like(nz))

    coef = coef_ref[...]                             # (TGH, 2, gnw): [z2x; z2y]
    z3 = z[:, None, :]                               # (TGH, 1, gnw)
    out_ref[:, 0:1, :] = label[:, None, :]
    out_ref[:, 1:2, :] = z3 * coef[:, 0:1, :]
    out_ref[:, 2:3, :] = z3 * coef[:, 1:2, :]
    out_ref[:, 3:4, :] = z3


def post_forward(mask, depth):
    """mask: (1, 1, H, W) float32 logits (NCHW); depth: (1, 1, H, W) float32 (mm)."""
    if depth is None:
        # TODO(synk): depth-is-None / softmax(C>1) branches are plain-JAX fallbacks.
        return jax.nn.sigmoid(mask) if mask.shape[1] == 1 else jax.nn.softmax(mask, axis=1)

    assert mask.shape[1] == 1, "Pallas path implements the C==1 (sigmoid) branch"
    H, W = mask.shape[2], mask.shape[3]
    assert H % GRID_H == 0 and W % GRID_W == 0
    gnh, gnw = H // GRID_H, W // GRID_W

    # Row-major (free) reshape -- no XLA transpose pass over the frame.
    mg = mask.reshape(gnh, GRID_H, W).astype(jnp.float32)
    dg = depth.reshape(gnh, GRID_H, W).astype(jnp.float32)
    coef, sel = _grid_constants(gnh, gnw)

    tgh = _pick_tgh(gnh, W)
    num_blocks = gnh // tgh

    out = pl.pallas_call(
        _post_kernel,
        out_shape=jax.ShapeDtypeStruct((gnh, 4, gnw), jnp.float32),
        grid_spec=pl.GridSpec(
            grid=(num_blocks,),
            in_specs=[
                pl.BlockSpec((tgh, GRID_H, W), lambda i: (i, 0, 0)),
                pl.BlockSpec((tgh, GRID_H, W), lambda i: (i, 0, 0)),
                pl.BlockSpec((W, gnw), lambda i: (0, 0)),
                pl.BlockSpec((tgh, 2, gnw), lambda i: (i, 0, 0)),
            ],
            out_specs=pl.BlockSpec((tgh, 4, gnw), lambda i: (i, 0, 0)),
        ),
        compiler_params=pltpu.CompilerParams(
            dimension_semantics=("parallel",)),
    )(mg, dg, sel, coef)

    # torch.stack((label, x, y, z), dim=1).flatten()  (grid cell g = gh*gnw + gw)
    return jnp.transpose(out, (0, 2, 1)).reshape(-1)


def post_reference(mask, depth):
    """Pure-JAX transcription of the PyTorch forward (for verification)."""
    m = jax.nn.sigmoid(mask) if mask.shape[1] == 1 else jax.nn.softmax(mask, axis=1)
    H, W = mask.shape[2], mask.shape[3]
    gnh, gnw = H // GRID_H, W // GRID_W
    thr = THRESHOLD * GRID_H * GRID_W
    mb = m > 0.5
    d = depth / 1000.0
    filtered = mb * d
    grids = (filtered.reshape(gnh, GRID_H, gnw, GRID_W)
             .transpose(0, 2, 1, 3)
             .reshape(gnh * gnw, GRID_H * GRID_W))
    nz = jnp.where(grids > 0, 1.0, 0.0).sum(axis=1)
    nz = jnp.where(nz == 0, -1.0, nz)
    z = grids.sum(axis=1) / nz
    label = jnp.where(nz > thr, 1.0, 0.0)
    z2x, z2y = z2xy_coefficient(GRID_H, GRID_W, gnh, gnw)
    x = z * jnp.asarray(z2x, jnp.float32)
    y = z * jnp.asarray(z2y, jnp.float32)
    return jnp.stack([label, x, y, z], axis=1).reshape(-1)


if __name__ == "__main__":
    key = jax.random.PRNGKey(0)
    k1, k2 = jax.random.split(key)
    H, W = 2 * GRID_H, 2 * GRID_W  # 72 x 128 -> 2x2 = 4 grid cells
    mask = jax.random.normal(k1, (1, 1, H, W), dtype=jnp.float32)
    depth = jax.random.uniform(k2, (1, 1, H, W), dtype=jnp.float32,
                               minval=200.0, maxval=5000.0)  # mm

    out = post_forward(mask, depth)
    out = jax.block_until_ready(out)

    ref = post_reference(mask, depth)
    np.testing.assert_allclose(np.asarray(out), np.asarray(ref),
                               rtol=1e-4, atol=1e-5)
    print("KERNEL_OK")
</pallas_src>

<mosaic_0001>
module attributes {stable_mosaic.version = 11 : i64} {
  func.func @_post_kernel(%arg0: i32, %arg1: memref<1x36x128xf32, #tpu.memory_space<vmem>>, %arg2: memref<1x36x128xf32, #tpu.memory_space<vmem>>, %arg3: memref<128x2xf32, #tpu.memory_space<vmem>>, %arg4: memref<1x2x2xf32, #tpu.memory_space<vmem>>, %arg5: memref<1x4x2xf32, #tpu.memory_space<vmem>>) attributes {dimension_semantics = [#tpu.dimension_semantics<parallel>], iteration_bounds = array<i64: 2>, scalar_prefetch = 0 : i64, scratch_operands = 0 : i64, tpu.core_type = #tpu.core_type<tc>, window_params = [{transform_indices = @transform_0, window_bounds = array<i64: 1, 36, 128>}, {transform_indices = @transform_1, window_bounds = array<i64: 1, 36, 128>}, {pipeline_mode = #tpu.pipeline_mode<synchronous>, transform_indices = @transform_2, window_bounds = array<i64: 128, 2>}, {transform_indices = @transform_3, window_bounds = array<i64: 1, 2, 2>}, {transform_indices = @transform_4, window_bounds = array<i64: 1, 4, 2>}]} {
    %c0 = arith.constant 0 : index
    %c0_0 = arith.constant 0 : index
    %c0_1 = arith.constant 0 : index
    %0 = vector.load %arg1[%c0, %c0_0, %c0_1] : memref<1x36x128xf32, #tpu.memory_space<vmem>>, vector<1x36x128xf32>
    %c0_2 = arith.constant 0 : index
    %c0_3 = arith.constant 0 : index
    %c0_4 = arith.constant 0 : index
    %1 = vector.load %arg2[%c0_2, %c0_3, %c0_4] : memref<1x36x128xf32, #tpu.memory_space<vmem>>, vector<1x36x128xf32>
    %cst = arith.constant 0.000000e+00 : f32
    %2 = vector.broadcast %cst : f32 to vector<1x36x128xf32>
    %3 = arith.cmpf ogt, %0, %2 : vector<1x36x128xf32>
    %cst_5 = arith.constant 0.000000e+00 : f32
    %4 = vector.broadcast %cst_5 : f32 to vector<1x36x128xf32>
    %5 = arith.select %3, %1, %4 : vector<1x36x128xi1>, vector<1x36x128xf32>
    %cst_6 = arith.constant 0.000000e+00 : f32
    %6 = vector.broadcast %cst_6 : f32 to vector<1x36x128xf32>
    %7 = arith.cmpf ogt, %5, %6 : vector<1x36x128xf32>
    %8 = arith.extui %7 : vector<1x36x128xi1> to vector<1x36x128xi32>
    %9 = arith.sitofp %8 : vector<1x36x128xi32> to vector<1x36x128xf32>
    %cst_7 = arith.constant dense<0.000000e+00> : vector<1x128xf32>
    %10 = vector.multi_reduction <add>, %5, %cst_7 [1] : vector<1x36x128xf32> to vector<1x128xf32>
    %cst_8 = arith.constant dense<0.000000e+00> : vector<1x128xf32>
    %11 = vector.multi_reduction <add>, %9, %cst_8 [1] : vector<1x36x128xf32> to vector<1x128xf32>
    %c0_9 = arith.constant 0 : index
    %c0_10 = arith.constant 0 : index
    %12 = vector.load %arg3[%c0_9, %c0_10] : memref<128x2xf32, #tpu.memory_space<vmem>>, vector<128x2xf32>
    %cst_11 = arith.constant dense<0.000000e+00> : vector<1x2xf32>
    %13 = tpu.matmul %10, %12, %cst_11 {dimension_numbers = #tpu.dot_dimension_numbers<[1], [0], [0], [1], [0, 0, 1, 1], [], []>} : vector<1x128xf32>, vector<128x2xf32>, vector<1x2xf32> -> vector<1x2xf32>
    %cst_12 = arith.constant dense<0.000000e+00> : vector<1x2xf32>
    %14 = tpu.matmul %11, %12, %cst_12 {dimension_numbers = #tpu.dot_dimension_numbers<[1], [0], [0], [1], [0, 0, 1, 1], [], []>} : vector<1x128xf32>, vector<128x2xf32>, vector<1x2xf32> -> vector<1x2xf32>
    %cst_13 = arith.constant 0.000000e+00 : f32
    %15 = vector.broadcast %cst_13 : f32 to vector<1x2xf32>
    %16 = arith.cmpf oeq, %14, %15 : vector<1x2xf32>
    %cst_14 = arith.constant 1.000000e+00 : f32
    %17 = vector.broadcast %cst_14 : f32 to vector<1x2xf32>
    %cst_15 = arith.constant 0.000000e+00 : f32
    %18 = vector.broadcast %cst_15 : f32 to vector<1x2xf32>
    %19 = arith.subf %18, %17 : vector<1x2xf32>
    %20 = arith.select %16, %19, %14 : vector<1x2xi1>, vector<1x2xf32>
    %cst_16 = arith.constant 1.000000e-03 : f32
    %21 = vector.broadcast %cst_16 : f32 to vector<1x2xf32>
    %22 = arith.mulf %13, %21 : vector<1x2xf32>
    %23 = arith.divf %22, %20 : vector<1x2xf32>
    %cst_17 = arith.constant 4.608000e+02 : f32
    %24 = vector.broadcast %cst_17 : f32 to vector<1x2xf32>
    %25 = arith.cmpf ogt, %20, %24 : vector<1x2xf32>
    %cst_18 = arith.constant 1.000000e+00 : f32
    %26 = vector.broadcast %cst_18 : f32 to vector<1x2xf32>
    %cst_19 = arith.constant 0.000000e+00 : f32
    %27 = vector.broadcast %cst_19 : f32 to vector<1x2xf32>
    %28 = arith.select %25, %26, %27 : vector<1x2xi1>, vector<1x2xf32>
    %c0_20 = arith.constant 0 : index
    %c0_21 = arith.constant 0 : index
    %c0_22 = arith.constant 0 : index
    %29 = vector.load %arg4[%c0_20, %c0_21, %c0_22] : memref<1x2x2xf32, #tpu.memory_space<vmem>>, vector<1x2x2xf32>
    %30 = vector.shape_cast %23 : vector<1x2xf32> to vector<1x1x2xf32>
    %31 = vector.shape_cast %28 : vector<1x2xf32> to vector<1x1x2xf32>
    %c0_23 = arith.constant 0 : index
    %c0_24 = arith.constant 0 : index
    %c0_25 = arith.constant 0 : index
    %32 = vector.load %arg5[%c0_23, %c0_24, %c0_25] : memref<1x4x2xf32, #tpu.memory_space<vmem>>, vector<1x1x2xf32>
    tpu.vector_store %arg5[%c0_23, %c0_24, %c0_25], %31 {strides = array<i32>} : memref<1x4x2xf32, #tpu.memory_space<vmem>>, vector<1x1x2xf32>,
    %33 = vector.extract_strided_slice %29 {offsets = [0, 0, 0], sizes = [1, 1, 2], strides = [1, 1, 1]} : vector<1x2x2xf32> to vector<1x1x2xf32>
    %34 = arith.mulf %30, %33 : vector<1x1x2xf32>
    %c0_26 = arith.constant 0 : index
    %c1 = arith.constant 1 : index
    %c0_27 = arith.constant 0 : index
    %35 = vector.load %arg5[%c0_26, %c1, %c0_27] : memref<1x4x2xf32, #tpu.memory_space<vmem>>, vector<1x1x2xf32>
    tpu.vector_store %arg5[%c0_26, %c1, %c0_27], %34 {strides = array<i32>} : memref<1x4x2xf32, #tpu.memory_space<vmem>>, vector<1x1x2xf32>,
    %36 = vector.extract_strided_slice %29 {offsets = [0, 1, 0], sizes = [1, 1, 2], strides = [1, 1, 1]} : vector<1x2x2xf32> to vector<1x1x2xf32>
    %37 = arith.mulf %30, %36 : vector<1x1x2xf32>
    %c0_28 = arith.constant 0 : index
    %c2 = arith.constant 2 : index
    %c0_29 = arith.constant 0 : index
    %38 = vector.load %arg5[%c0_28, %c2, %c0_29] : memref<1x4x2xf32, #tpu.memory_space<vmem>>, vector<1x1x2xf32>
    tpu.vector_store %arg5[%c0_28, %c2, %c0_29], %37 {strides = array<i32>} : memref<1x4x2xf32, #tpu.memory_space<vmem>>, vector<1x1x2xf32>,
    %c0_30 = arith.constant 0 : index
    %c3 = arith.constant 3 : index
    %c0_31 = arith.constant 0 : index
    %39 = vector.load %arg5[%c0_30, %c3, %c0_31] : memref<1x4x2xf32, #tpu.memory_space<vmem>>, vector<1x1x2xf32>
    tpu.vector_store %arg5[%c0_30, %c3, %c0_31], %30 {strides = array<i32>} : memref<1x4x2xf32, #tpu.memory_space<vmem>>, vector<1x1x2xf32>,
    return
  }
  func.func @transform_0(%arg0: i32) -> (i32, i32, i32) {
    %c0_i32 = arith.constant 0 : i32
    %c0_i32_0 = arith.constant 0 : i32
    %c0_i32_1 = arith.constant 0 : i32
    return %arg0, %c0_i32, %c0_i32_0 : i32, i32, i32
  }
  func.func @transform_1(%arg0: i32) -> (i32, i32, i32) {
    %c0_i32 = arith.constant 0 : i32
    %c0_i32_0 = arith.constant 0 : i32
    %c0_i32_1 = arith.constant 0 : i32
    return %arg0, %c0_i32, %c0_i32_0 : i32, i32, i32
  }
  func.func @transform_2(%arg0: i32) -> (i32, i32) {
    %c0_i32 = arith.constant 0 : i32
    %c0_i32_0 = arith.constant 0 : i32
    %c0_i32_1 = arith.constant 0 : i32
    return %c0_i32, %c0_i32_0 : i32, i32
  }
  func.func @transform_3(%arg0: i32) -> (i32, i32, i32) {
    %c0_i32 = arith.constant 0 : i32
    %c0_i32_0 = arith.constant 0 : i32
    %c0_i32_1 = arith.constant 0 : i32
    return %arg0, %c0_i32, %c0_i32_0 : i32, i32, i32
  }
  func.func @transform_4(%arg0: i32) -> (i32, i32, i32) {
    %c0_i32 = arith.constant 0 : i32
    %c0_i32_0 = arith.constant 0 : i32
    %c0_i32_1 = arith.constant 0 : i32
    return %arg0, %c0_i32, %c0_i32_0 : i32, i32, i32
  }
}

</mosaic_0001>

<bundles_post_ra>
// kernel: tpu_custom_call.1
= control target key start
LH: loop header
LB: loop body
LE: loop exit
PB: predicated region body
PF: predicated region fallthrough
CT: control target
= control target key end

     0   :  { %s517_s15 = smov 0   ;;  %s609_s0 = inlined_call_operand.vmem [shape: f32[2,36,128], index: 0, kind: input, shape index: {}]   ;;  %s610_s1 = inlined_call_operand.vmem [shape: f32[2,36,128], index: 1, kind: input, shape index: {}]   ;;  %s611_s2 = inlined_call_operand.vmem [shape: f32[128,2], index: 2, kind: input, shape index: {}]   ;;  %s612_s3 = inlined_call_operand.vmem [shape: f32[2,2,2], index: 3, kind: input, shape index: {}]   ;;  %s613_s4 = inlined_call_operand.vmem [shape: f32[2,4,2], index: 4, kind: output, shape index: {}]  }
   0x1 LB: > { %s455_s16 = sadd.s32 4294967295, %s489_s15   ;;  %p459_p0 = scmp.ge.s32.totalorder %s489_s15, 1  ;;  %s489_s15 = sphi %s517_s15, %s14_s15  }
   0x2   : > { %p181_p1 = scmp.lt.s32.totalorder %s489_s15, 3 }
   0x4   : > { %p182_p2 = pnand %p459_p0, %p181_p1 }
   0x5   : > { %p215_p3 = scmp.lt.s32.totalorder (!%p182_p2), %s455_s16, 1 }
   0x6   : > { %185 = sbr.rel (%p182_p2) target bundleno = 194 (0xc2), region = 36 }
   0xb   : > { %v306_v0 = vld [vmem:[%s611_s2 + $0x78] sm:$0xff]  ;;  %v305_v1 = vld [vmem:[%s611_s2 + $0x70] sm:$0xff]  ;;  %v304_v2 = vld [vmem:[%s611_s2 + $0x68] sm:$0xff]  ;;  %s615_s16 = smov (!%p215_p3, %s455_s16), 1  ;;  %v491_v23 = vmov 0.0   ;;  %vm271_vm10 = vcmask 1043456  }
   0xc   : > { %327 = vmatpush.msra.mxu1 %v306_v0  ;;  %307 = vmatpush.msra.mxu0 %v306_v0  ;;  %v303_v3 = vld [vmem:[%s611_s2 + $0x60] sm:$0xff]  ;;  %s471_s25 = smul.u32 40, %s615_s16  ;;  %v302_v4 = vld [vmem:[%s611_s2 + $0x58] sm:$0xff]  ;;  %v301_v5 = vld [vmem:[%s611_s2 + $0x50] sm:$0xff]  ;;  %vm368_vm12 = vcmask 8192   ;;  %s462_s10 = sshll.u32 %s615_s16, 1 }
   0xd   : > { %v300_v9 = vld [vmem:[%s611_s2 + $0x48] sm:$0xff]  ;;  %v299_v22 = vld [vmem:[%s611_s2 + $0x40] sm:$0xff]  ;;  %v298_v29 = vld [vmem:[%s611_s2 + $0x38] sm:$0xff]  ;;  %s228_s13 = scalar_lea.vmem %s612_s3, %s462_s10 }
   0xe   : > { %328 = vmatpush.msra.mxu1 %v305_v1  ;;  %308 = vmatpush.msra.mxu0 %v305_v1  ;;  %s219_s6 = scalar_lea.vmem %s609_s0, %s471_s25  ;;  %s224_s9 = scalar_lea.vmem %s610_s1, %s471_s25  ;;  %v297_v33 = vld [vmem:[%s611_s2 + $0x30] sm:$0xff]  ;;  %v296_v38 = vld [vmem:[%s611_s2 + $0x28] sm:$0xff]  ;;  %v295_v41 = vld [vmem:[%s611_s2 + $0x20] sm:$0xff] }
   0xf   : > { %v233_v6 = vld [vmem:[%s219_s6] sm:$0xff]  ;;  %v234_v7 = vld [vmem:[%s219_s6 + $0x8] sm:$0xff]  ;;  %v235_v8 = vld [vmem:[%s219_s6 + $0x10] sm:$0xff] }
  0x10   : > { %329 = vmatpush.msra.mxu1 %v304_v2  ;;  %309 = vmatpush.msra.mxu0 %v304_v2  ;;  %v236_v10 = vld [vmem:[%s219_s6 + $0x18] sm:$0xff]  ;;  %v237_v11 = vld [vmem:[%s219_s6 + $0x20] sm:$0xf]  ;;  %vm243_vm0 = vcmp.gt.f32.partialorder %v233_v6, 0.0  ;;  %vm244_vm1 = vcmp.gt.f32.partialorder %v234_v7, 0.0  ;;  %v239_v13 = vld [vmem:[%s224_s9 + $0x8] sm:$0xff] }
  0x11   : > { %v238_v12 = vld [vmem:[%s224_s9] sm:$0xff]  ;;  %v240_v14 = vld [vmem:[%s224_s9 + $0x10] sm:$0xff]  ;;  %v241_v15 = vld [vmem:[%s224_s9 + $0x18] sm:$0xff]  ;;  %vm245_vm2 = vcmp.gt.f32.partialorder %v235_v8, 0.0  ;;  %vm246_vm3 = vcmp.gt.f32.partialorder %v236_v10, 0.0  ;;  %vm247_vm4 = vcmp.gt.f32.partialorder %v237_v11, 0.0 }
  0x12   : > { %330 = vmatpush.msra.mxu1 %v303_v3  ;;  %310 = vmatpush.msra.mxu0 %v303_v3  ;;  %v242_v16 = vld [vmem:[%s224_s9 + $0x20] sm:$0xf]  ;;  %v248_v17 = vsel %vm243_vm0, %v238_v12, 0.0  ;;  %v249_v18 = vsel %vm244_vm1, %v239_v13, 0.0  ;;  %v250_v19 = vsel %vm245_vm2, %v240_v14, 0.0  ;;  %v251_v20 = vsel %vm246_vm3, %v241_v15, 0.0 }
  0x13   : > { %v252_v21 = vsel %vm247_vm4, %v242_v16, 0.0  ;;  %vm253_vm5 = vcmp.gt.f32.partialorder %v248_v17, 0.0  ;;  %vm254_vm6 = vcmp.gt.f32.partialorder %v249_v18, 0.0  ;;  %vm255_vm7 = vcmp.gt.f32.partialorder %v250_v19, 0.0  ;;  %v294_v44 = vld [vmem:[%s611_s2 + $0x18] sm:$0xff]  ;;  %v293_v47 = vld [vmem:[%s611_s2 + $0x10] sm:$0xff] }
  0x14   : > { %331 = vmatpush.msra.mxu1 %v302_v4  ;;  %311 = vmatpush.msra.mxu0 %v302_v4  ;;  %vm256_vm8 = vcmp.gt.f32.partialorder %v251_v20, 0.0  ;;  %vm257_vm9 = vcmp.gt.f32.partialorder %v252_v21, 0.0  ;;  %v464_v24 = vsel %vm253_vm5, 1.0, %v491_v23  ;;  %v465_v25 = vsel %vm254_vm6, 1.0, %v491_v23  ;;  %v292_v50 = vld [vmem:[%s611_s2 + $0x8] sm:$0xff]  ;;  %v291_v53 = vld [vmem:[%s611_s2] sm:$0xff] }
  0x15   : > { %v466_v26 = vsel %vm255_vm7, 1.0, %v491_v23  ;;  %v468_v27 = vsel %vm257_vm9, 1.0, %v491_v23  ;;  %v280_v28 = vadd.f32 %v465_v25, %v464_v24  ;;  %v467_v30 = vsel %vm256_vm8, 1.0, %v491_v23  ;;  %s463_s6 = sshll.u32 %s615_s16, 2 }
  0x16   : > { %332 = vmatpush.msra.mxu1 %v301_v5  ;;  %312 = vmatpush.msra.mxu0 %v301_v5  ;;  %v268_v31 = vadd.f32 %v249_v18, %v248_v17  ;;  %v283_v34 = vsel %vm271_vm10, %v468_v27, 0.0  ;;  %v272_v37 = vsel %vm271_vm10, %v252_v21, 0.0  ;;  %s591_s9 = scalar_lea.vmem %s613_s4, %s463_s6  ;;  %v367_v5 = vld [vmem:[%s228_s13] sm:$0x3] }
  0x17   : > { %v281_v32 = vadd.f32 %v466_v26, %v280_v28  ;;  %v373_v10 = vrot.slane %v367_v5, 1 }
  0x18   : > { %333 = vmatpush.msra.mxu1 %v300_v9  ;;  %313 = vmatpush.msra.mxu0 %v300_v9  ;;  %v269_v35 = vadd.f32 %v268_v31, %v250_v19 }
  0x19   : > { %v282_v36 = vadd.f32 %v467_v30, %v281_v32 }
  0x1a   : > { %334 = vmatpush.msra.mxu1 %v299_v22  ;;  %314 = vmatpush.msra.mxu0 %v299_v22  ;;  %v270_v39 = vadd.f32 %v269_v35, %v251_v20 }
  0x1b   : > { %v284_v40 = vadd.f32 %v283_v34, %v282_v36 }
  0x1c   : > { %335 = vmatpush.msra.mxu1 %v298_v29  ;;  %315 = vmatpush.msra.mxu0 %v298_v29  ;;  %v273_v42 = vadd.f32 %v272_v37, %v270_v39 }
  0x1d   : > { %v285_v43 = vrot.slane %v284_v40, 4 }
  0x1e   : > { %336 = vmatpush.msra.mxu1 %v297_v33  ;;  %316 = vmatpush.msra.mxu0 %v297_v33  ;;  %v274_v45 = vrot.slane %v273_v42, 4 }
  0x1f   : > { %v286_v46 = vadd.f32 %v285_v43, %v284_v40 }
  0x20   : > { %337 = vmatpush.msra.mxu1 %v296_v38  ;;  %317 = vmatpush.msra.mxu0 %v296_v38  ;;  %v275_v48 = vadd.f32 %v274_v45, %v273_v42 }
  0x21   : > { %v287_v49 = vrot.slane %v286_v46, 2 }
  0x22   : > { %338 = vmatpush.msra.mxu1 %v295_v41  ;;  %318 = vmatpush.msra.mxu0 %v295_v41  ;;  %v276_v51 = vrot.slane %v275_v48, 2 }
  0x23   : > { %v288_v52 = vadd.f32 %v287_v49, %v286_v46 }
  0x24   : > { %339 = vmatpush.msra.mxu1 %v294_v44  ;;  %319 = vmatpush.msra.mxu0 %v294_v44  ;;  %v277_v54 = vadd.f32 %v276_v51, %v275_v48 }
  0x25   : > { %v289_v55 = vrot.slane %v288_v52, 1 }
  0x26   : > { %340 = vmatpush.msra.mxu1 %v293_v47  ;;  %320 = vmatpush.msra.mxu0 %v293_v47  ;;  %v278_v56 = vrot.slane %v277_v54, 1 }
  0x27   : > { %v290_v57 = vadd.f32 %v289_v55, %v288_v52 }
  0x28   : > { %341 = vmatpush.msra.mxu1 %v292_v50  ;;  %321 = vmatpush.msra.mxu0 %v292_v50  ;;  %v279_v58 = vadd.f32 %v278_v56, %v277_v54 }
  0x2a   : > { %342 = vmatpush.msra.mxu1 %v291_v53  ;;  %322 = vmatpush.msra.mxu0 %v291_v53 }
  0x2b   : > { %343 = vmatmul.f32.vlgmr.msra.gmra.mxu1 %v290_v57  ;;  %323 = vmatmul.f32.vlgmr.msra.gmra.mxu0 %v279_v58 }
  0xa8   : > { %v344_v59 = vpop.f32.mrf.mxu1  ;;  %v324_v1 = vpop.f32.mrf.mxu0 }
  0xa9   : > { %vm347_vm11 = vcmp.eq.f32.partialorder %v344_v59, 0.0  ;;  %v349_v6 = vmul.f32 0.001, %v324_v1 }
  0xaa   : > { %v348_v60 = vsel %vm347_vm11, -1.0, %v344_v59 }
  0xab   : > { %481 = vrcp.f32 %v348_v60  ;;  %vm365_vm13 = vcmp.gt.f32.partialorder %v348_v60, 460.8  ;;  %v361_v2 = vand.u32 2147483648, %v348_v60  ;;  %v359_v4 = vand.u32 2147483647, %v348_v60 }
  0xac   : > { %v366_v61 = vsel %vm365_vm13, 1.0, %v491_v23  ;;  %vm355_vm15 = vweird.f32 %v348_v60 }
  0xad   : > { %369 = vst.msk [vmem:[%s591_s9] sm:$0x1] %vm368_vm12, %v366_v61  ;;  %v362_v8 = vor.u32 1.1754944e-38, %v361_v2  ;;  %vm360_vm1 = vcmp.eq.f32.partialorder %v359_v4, 8.507059e+37 }
  0xb1   : > { %v482_v62 = vpop.eup %481 }
  0xb2   : > { %v351_v63 = vmul.f32 %v482_v62, %v348_v60  ;;  %vm356_vm14 = vweird.f32 %v482_v62 }
  0xb3   : > { %vm357_vm0 = vmor %vm355_vm15, %vm356_vm14 }
  0xb4   : > { %v352_v0 = vsub.f32 1.0, %v351_v63 }
  0xb6   : > { %v353_v3 = vmul.f32 %v482_v62, %v352_v0 }
  0xb8   : > { %v354_v7 = vadd.f32 %v482_v62, %v353_v3 }
  0xba   : > { %v358_v9 = vsel %vm357_vm0, %v482_v62, %v354_v7 }
  0xbb   : > { %v363_v11 = vsel %vm360_vm1, %v362_v8, %v358_v9 }
  0xbc   : > { %v364_v12 = vmul.f32 %v363_v11, %v349_v6 }
  0xbe   : > { %v370_v13 = vmul.f32 %v367_v5, %v364_v12  ;;  %v375_v14 = vmul.f32 %v373_v10, %v364_v12  ;;  %377 = vst.msk [vmem:[%s591_s9 + $0x3] sm:$0x1] %vm368_vm12, %v364_v12 }
  0xc0   : > { %371 = vst.msk [vmem:[%s591_s9 + $0x1] sm:$0x1] %vm368_vm12, %v370_v13 }
  0xc1   : > { %376 = vst.msk [vmem:[%s591_s9 + $0x2] sm:$0x1] %vm368_vm12, %v375_v14 }
  0xc2 PF: > { %s14_s15 = sadd.s32 1, %s489_s15  }
  0xc3   : > { %p11_p4 = scmp.ge.s32.totalorder %s14_s15, 4  }
  0xc5   :  { %13 = sbr.rel (!%p11_p4) target bundleno = 1 (0x1), region = 72 }

</bundles_post_ra>
